<compile_context>
chip_gen: v7x
topology: tpu7x:2x2x1
jax: 0.10.0
libtpu: 0.0.40
codegen_flags: <defaults>
</compile_context>

<pallas_src>
import functools

import jax
import jax.numpy as jnp
from jax import lax
from jax.experimental import pallas as pl
from jax.experimental.pallas import tpu as pltpu

NEG_LIMIT_DEFAULT = -1e9


def _round_up(x, m):
    return ((x + m - 1) // m) * m


def _attn_span_kernel(neg_limit, hidden,
                      spans_ref, logit_ref, t_ref, we_ref, cls_ref,
                      w1_ref, w2_ref, b2_ref,
                      out_ref, xcat_ref):
    """grid = (batch, span-block, dff-block)."""
    d = pl.program_id(2)

    # ---- attention pooling: run once per (batch, span-block); cache in xcat_ref ----
    @pl.when(d == 0)
    def _():
        spans = spans_ref[...]                        # (TILE_N, 3) int32
        starts = spans[:, 0:1]                        # (TILE_N, 1)
        ends = spans[:, 1:2]                          # inclusive end
        smask = spans[:, 2:3] != 0
        n_tile = spans.shape[0]
        seq = t_ref.shape[0]

        pos = lax.broadcasted_iota(jnp.int32, (n_tile, seq), 1)
        valid = (pos >= starts) & (pos <= ends) & smask

        # masked softmax over the sequence axis (f32); logits precomputed in wrapper
        scores = jnp.where(valid, logit_ref[...], neg_limit)       # (TILE_N, S)
        m = jnp.max(scores, axis=-1, keepdims=True)
        e = jnp.exp(scores - m)
        denom = jnp.sum(e, axis=-1, keepdims=True)
        w = e * pl.reciprocal(denom, approx=True)                   # EUP, off VALU
        w = jnp.where(valid, w, 0.0)                  # fully-masked spans -> 0 pooled

        pooled = jnp.dot(w.astype(jnp.bfloat16), t_ref[...],
                         preferred_element_type=jnp.float32)        # (TILE_N, H) f32

        # pack [pooled | width_emb] so the projection is ONE matmul with K = H + We
        xcat_ref[:, :hidden] = pooled.astype(jnp.bfloat16)
        xcat_ref[:, hidden:] = we_ref[...]

        # output tile is resident across the Dff axis: initialise with bias once
        out_ref[...] = jnp.broadcast_to(b2_ref[...], out_ref.shape).astype(out_ref.dtype)

    # ---- projection over this Dff block (cls @ W1c + b1 folded into cls_ref) ----
    h = (jnp.dot(xcat_ref[...], w1_ref[...], preferred_element_type=jnp.float32)
         + cls_ref[...])                              # (TILE_N, TILE_DFF) f32
    h = jnp.maximum(h, 0.0)                           # ReLU; dropout = identity (eval)
    out_ref[...] += jnp.dot(h.astype(jnp.bfloat16), w2_ref[...],
                            preferred_element_type=jnp.float32).astype(out_ref.dtype)


def attn_forward(token_reps, span_ids, span_masks, span_widths, cls_reps, params,
                 neg_limit=NEG_LIMIT_DEFAULT):
    B, S, H = token_reps.shape
    N = span_ids.shape[1]
    We = params["width_emb"].shape[1]
    Dff = params["w1p"].shape[1]
    Kc = H + We

    # ---------- generation-aware VMEM budget ----------
    try:
        kind = jax.devices()[0].device_kind.lower()
    except Exception:
        kind = ""
    try:
        vmem_cap = int(pltpu.get_tpu_info().vmem_capacity_bytes)
    except Exception:
        if any(tag in kind for tag in ("v7", "7x")):
            vmem_cap = 64 * 1024 * 1024
        elif any(tag in kind for tag in ("v4", "v5", "v6")):
            vmem_cap = 128 * 1024 * 1024
        else:
            vmem_cap = 64 * 1024 * 1024
    budget = int(0.8 * vmem_cap)                      # headroom for compiler scratch
    is_v5e = ("v5e" in kind) or ("v5 lite" in kind) or ("v5lite" in kind)

    def _lane(x):
        return _round_up(max(int(x), 1), 128)

    def vmem_usage(tile_n, tile_dff):
        u = 0
        u += 2 * tile_n * _lane(3) * 4                # spans int32 (double-buffered)
        u += 2 * 8 * _lane(S) * 4                     # logits (1, S) f32
        u += 2 * S * _lane(H) * 2                     # token tile bf16
        u += 2 * tile_n * _lane(We) * 2               # width embeddings bf16
        u += 2 * 8 * _lane(tile_dff) * 4              # cls projection (1, tile_dff) f32
        u += 2 * _round_up(Kc, 16) * _lane(tile_dff) * 2   # W1 (pooled|width) bf16
        u += 2 * tile_dff * _lane(H) * 2              # W2 bf16
        u += 2 * 8 * _lane(H) * 4                     # b2 f32
        u += 2 * tile_n * _lane(H) * 4                # output tile f32
        u += tile_n * _lane(Kc) * 2                   # xcat scratch bf16
        u += 6 * tile_n * _lane(S) * 4                # softmax intermediates f32
        u += 3 * tile_n * _lane(tile_dff) * 4         # h / relu / bf16-copy temporaries
        return u

    # span-block size: 128 on v5e (128x128 MXU) or long sequences, else 256
    tile_n_cap = 128 if (is_v5e or S >= 1024) else 256
    TILE_N = min(_round_up(N, 8), tile_n_cap)
    N_pad = _round_up(N, TILE_N)
    NB = N_pad // TILE_N
    # v7x megacore: guarantee >= 2 parallel (b, n) blocks when possible
    if B * NB < 2 and TILE_N >= 16:
        TILE_N = _round_up(TILE_N // 2, 8)
        N_pad = _round_up(N, TILE_N)
        NB = N_pad // TILE_N

    # Dff blocking: strongly prefer DB == 1 (weights fetched exactly once per grid)
    TILE_DFF = Dff
    if vmem_usage(TILE_N, TILE_DFF) > budget and TILE_N > 128:
        if vmem_usage(128, Dff) <= budget:
            TILE_N = 128
            N_pad = _round_up(N, TILE_N)
            NB = N_pad // TILE_N
    if vmem_usage(TILE_N, TILE_DFF) > budget:
        TILE_DFF = 128
        for cand in (2048, 1024, 512, 256):
            if cand < Dff and vmem_usage(TILE_N, cand) <= budget:
                TILE_DFF = cand
                break
    Dff_pad = _round_up(Dff, TILE_DFF)
    DB = Dff_pad // TILE_DFF

    vmem_limit = int(min(budget, max(32 * 1024 * 1024,
                                     int(1.3 * vmem_usage(TILE_N, TILE_DFF)))))

    # ---------- glue precompute (plain JAX) ----------
    starts = span_ids[..., 0].astype(jnp.int32)
    ends = span_ids[..., 1].astype(jnp.int32) - 1     # inclusive end
    smask = span_masks.astype(jnp.int32)
    spans = jnp.stack([starts, ends, smask], axis=-1)  # (B, N, 3) int32

    wemb = params["width_emb"][span_widths]            # (B, N, We) gather (glue)

    # M=1 attention-logit GEMV done here instead of wasting an MXU pass per block
    logits = (jnp.einsum("bsh,ho->bs", token_reps, params["w_attn"])
              + params["b_attn"][0, 0])[:, None, :].astype(jnp.float32)   # (B, 1, S)

    # cls @ W1_cls + b1 folded into a per-batch (1, Dff) bias
    cls_proj = (jnp.einsum("bh,hd->bd", cls_reps, params["w1c"])
                + params["b1"][0])[:, None, :].astype(jnp.float32)        # (B, 1, Dff)

    if N_pad != N:
        pad_n = [(0, 0), (0, N_pad - N), (0, 0)]       # padded spans: smask == 0
        spans = jnp.pad(spans, pad_n)
        wemb = jnp.pad(wemb, pad_n)
    if Dff_pad != Dff:
        cls_proj = jnp.pad(cls_proj, [(0, 0), (0, 0), (0, Dff_pad - Dff)])

    # ---------- bf16 MXU operands (cast once so DMAs shrink too) ----------
    t_bf = token_reps.astype(jnp.bfloat16)
    we_bf = wemb.astype(jnp.bfloat16)
    w1_bf = jnp.concatenate([params["w1p"], params["w1w"]], axis=0).astype(jnp.bfloat16)
    w2_bf = params["w2"].astype(jnp.bfloat16)
    if Dff_pad != Dff:
        w1_bf = jnp.pad(w1_bf, [(0, 0), (0, Dff_pad - Dff)])
        w2_bf = jnp.pad(w2_bf, [(0, Dff_pad - Dff), (0, 0)])
    b2 = params["b2"].astype(jnp.float32)              # (1, H)

    kernel = functools.partial(_attn_span_kernel, float(neg_limit), H)

    out = pl.pallas_call(
        kernel,
        out_shape=jax.ShapeDtypeStruct((B, N_pad, H), jnp.float32),
        grid_spec=pltpu.PrefetchScalarGridSpec(
            num_scalar_prefetch=0,
            grid=(B, NB, DB),
            in_specs=[
                pl.BlockSpec((pl.Squeezed(), TILE_N, 3), lambda b, n, d: (b, n, 0)),
                pl.BlockSpec((pl.Squeezed(), 1, S), lambda b, n, d: (b, 0, 0)),
                pl.BlockSpec((pl.Squeezed(), S, H), lambda b, n, d: (b, 0, 0)),
                pl.BlockSpec((pl.Squeezed(), TILE_N, We), lambda b, n, d: (b, n, 0)),
                pl.BlockSpec((pl.Squeezed(), 1, TILE_DFF), lambda b, n, d: (b, 0, d)),
                pl.BlockSpec((Kc, TILE_DFF), lambda b, n, d: (0, d)),    # W1 [pooled|width]
                pl.BlockSpec((TILE_DFF, H), lambda b, n, d: (d, 0)),     # W2
                pl.BlockSpec((1, H), lambda b, n, d: (0, 0)),            # b2
            ],
            out_specs=pl.BlockSpec((pl.Squeezed(), TILE_N, H),
                                   lambda b, n, d: (b, n, 0)),
            scratch_shapes=[pltpu.VMEM((TILE_N, Kc), jnp.bfloat16)],     # [pooled|width]
        ),
        compiler_params=pltpu.CompilerParams(
            dimension_semantics=("parallel", "parallel", "arbitrary"),
            vmem_limit_bytes=vmem_limit),
    )(spans, logits, t_bf, we_bf, cls_proj, w1_bf, w2_bf, b2)

    return out[:, :N, :]


def init_params(key, hidden, width_vocab, width_dim, ffn_ratio, cls_flag=True):
    keys = jax.random.split(key, 7)
    internal = hidden + width_dim + (hidden if cls_flag else 0)
    dff = hidden * ffn_ratio

    def xavier(k, shape):
        lim = (6.0 / (shape[0] + shape[1])) ** 0.5
        return jax.random.uniform(k, shape, jnp.float32, -lim, lim)

    w_attn = xavier(keys[0], (hidden, 1))
    b_attn = 0.1 * jax.random.normal(keys[1], (1, 1), jnp.float32)
    w1 = xavier(keys[2], (internal, dff))
    b1 = 0.1 * jax.random.normal(keys[3], (1, dff), jnp.float32)
    w2 = xavier(keys[4], (dff, hidden))
    b2 = 0.1 * jax.random.normal(keys[5], (1, hidden), jnp.float32)
    width_emb = 0.02 * jax.random.normal(keys[6], (width_vocab, width_dim), jnp.float32)
    return dict(
        w_attn=w_attn, b_attn=b_attn,
        w1p=w1[:hidden], w1w=w1[hidden:hidden + width_dim], w1c=w1[hidden + width_dim:],
        b1=b1, w2=w2, b2=b2, width_emb=width_emb)


def reference(token_reps, span_ids, span_masks, span_widths, cls_reps, params, neg_limit):
    # Pure-JAX f32 mirror of Attn.forward (attn_pooler_v + concat + projection).
    starts = span_ids[..., 0]
    ends = span_ids[..., 1] - 1
    S = token_reps.shape[1]
    pos = jnp.arange(S)[None, None, :]
    valid = (pos >= starts[..., None]) & (pos <= ends[..., None]) & span_masks[..., None]
    logits = jnp.einsum("bsh,ho->bs", token_reps, params["w_attn"]) + params["b_attn"][0, 0]
    scores = jnp.where(valid, logits[:, None, :], neg_limit)
    w = jax.nn.softmax(scores, axis=-1)
    w = jnp.where(valid, w, 0.0)
    pooled = jnp.einsum("bns,bsh->bnh", w, token_reps)
    wemb = params["width_emb"][span_widths]
    N = span_ids.shape[1]
    cls_e = jnp.broadcast_to(cls_reps[:, None, :], (cls_reps.shape[0], N, cls_reps.shape[1]))
    x = jnp.concatenate([pooled, wemb, cls_e], axis=-1)
    w1 = jnp.concatenate([params["w1p"], params["w1w"], params["w1c"]], axis=0)
    h = jax.nn.relu(x @ w1 + params["b1"][0])
    return h @ params["w2"] + params["b2"][0]


if __name__ == "__main__":
    key = jax.random.PRNGKey(0)
    B, S, H = 2, 16, 32
    max_span_width = 4
    We = 8
    ffn_ratio = 2
    N = 16  # num_spans

    k1, k2, k3, k4, k5, kp = jax.random.split(key, 6)
    token_reps = jax.random.normal(k1, (B, S, H), jnp.float32)
    cls_reps = jax.random.normal(k2, (B, H), jnp.float32)
    starts = jax.random.randint(k3, (B, N), 0, S - max_span_width)
    widths = jax.random.randint(k4, (B, N), 1, max_span_width + 1)
    ends = starts + widths  # python-list-style exclusive ends (always > start)
    span_ids = jnp.stack([starts, ends], axis=-1).astype(jnp.int32)
    span_masks = jax.random.uniform(k5, (B, N)) > 0.2
    span_widths = jnp.clip(ends - starts, 0, max_span_width).astype(jnp.int32)

    params = init_params(kp, H, max_span_width + 1, We, ffn_ratio, cls_flag=True)

    out = attn_forward(token_reps, span_ids, span_masks, span_widths, cls_reps, params)
    out = jax.block_until_ready(out)

    ref = reference(token_reps, span_ids, span_masks, span_widths, cls_reps, params,
                    NEG_LIMIT_DEFAULT)
    assert out.shape == (B, N, H)
    # bf16 MXU operands + approx softmax reciprocal vs f32 reference -> loose tolerance.
    assert jnp.allclose(out, ref, atol=1e-1, rtol=1e-1), float(jnp.max(jnp.abs(out - ref)))
    print("KERNEL_OK")
</pallas_src>

<mosaic_0001>
module attributes {stable_mosaic.version = 11 : i64} {
  func.func @_attn_span_kernel(%arg0: i32, %arg1: i32, %arg2: i32, %arg3: memref<1x16x3xi32, #tpu.memory_space<vmem>>, %arg4: memref<1x1x16xf32, #tpu.memory_space<vmem>>, %arg5: memref<1x16x32xbf16, #tpu.memory_space<vmem>>, %arg6: memref<1x16x8xbf16, #tpu.memory_space<vmem>>, %arg7: memref<1x1x64xf32, #tpu.memory_space<vmem>>, %arg8: memref<40x64xbf16, #tpu.memory_space<vmem>>, %arg9: memref<64x32xbf16, #tpu.memory_space<vmem>>, %arg10: memref<1x32xf32, #tpu.memory_space<vmem>>, %arg11: memref<1x16x32xf32, #tpu.memory_space<vmem>>, %arg12: memref<16x40xbf16, #tpu.memory_space<vmem>>) attributes {dimension_semantics = [#tpu.dimension_semantics<parallel>, #tpu.dimension_semantics<parallel>, #tpu.dimension_semantics<arbitrary>], iteration_bounds = array<i64: 2, 1, 1>, scalar_prefetch = 0 : i64, scratch_operands = 1 : i64, tpu.core_type = #tpu.core_type<tc>, window_params = [{transform_indices = @transform_0, window_bounds = array<i64: 1, 16, 3>}, {transform_indices = @transform_1, window_bounds = array<i64: 1, 1, 16>}, {transform_indices = @transform_2, window_bounds = array<i64: 1, 16, 32>}, {transform_indices = @transform_3, window_bounds = array<i64: 1, 16, 8>}, {transform_indices = @transform_4, window_bounds = array<i64: 1, 1, 64>}, {transform_indices = @transform_5, window_bounds = array<i64: 40, 64>}, {transform_indices = @transform_6, window_bounds = array<i64: 64, 32>}, {pipeline_mode = #tpu.pipeline_mode<synchronous>, transform_indices = @transform_7, window_bounds = array<i64: 1, 32>}, {transform_indices = @transform_8, window_bounds = array<i64: 1, 16, 32>}]} {
    %c0_i32 = arith.constant 0 : i32
    %0 = arith.cmpi eq, %arg2, %c0_i32 : i32
    %1 = arith.extui %0 : i1 to i32
    %c0_i32_0 = arith.constant 0 : i32
    %2 = arith.cmpi ne, %1, %c0_i32_0 : i32
    scf.if %2 {
      %c0_17 = arith.constant 0 : index
      %c0_18 = arith.constant 0 : index
      %c0_19 = arith.constant 0 : index
      %21 = vector.load %arg3[%c0_17, %c0_18, %c0_19] : memref<1x16x3xi32, #tpu.memory_space<vmem>>, vector<1x16x3xi32>
      %22 = vector.shape_cast %21 : vector<1x16x3xi32> to vector<16x3xi32>
      %23 = vector.extract_strided_slice %22 {offsets = [0, 0], sizes = [16, 1], strides = [1, 1]} : vector<16x3xi32> to vector<16x1xi32>
      %24 = vector.extract_strided_slice %22 {offsets = [0, 1], sizes = [16, 1], strides = [1, 1]} : vector<16x3xi32> to vector<16x1xi32>
      %25 = vector.extract_strided_slice %22 {offsets = [0, 2], sizes = [16, 1], strides = [1, 1]} : vector<16x3xi32> to vector<16x1xi32>
      %c0_i32_20 = arith.constant 0 : i32
      %26 = vector.broadcast %c0_i32_20 : i32 to vector<16x1xi32>
      %27 = arith.cmpi ne, %25, %26 : vector<16x1xi32>
      %28 = tpu.iota {dimensions = array<i32: 1>} : vector<16x16xi32>
      %29 = vector.broadcast %23 : vector<16x1xi32> to vector<16x16xi32>
      %30 = arith.cmpi sge, %28, %29 : vector<16x16xi32>
      %31 = vector.broadcast %24 : vector<16x1xi32> to vector<16x16xi32>
      %32 = arith.cmpi sle, %28, %31 : vector<16x16xi32>
      %33 = arith.andi %30, %32 : vector<16x16xi1>
      %34 = vector.broadcast %27 : vector<16x1xi1> to vector<16x16xi1>
      %35 = arith.andi %33, %34 : vector<16x16xi1>
      %c0_21 = arith.constant 0 : index
      %c0_22 = arith.constant 0 : index
      %c0_23 = arith.constant 0 : index
      %36 = vector.load %arg4[%c0_21, %c0_22, %c0_23] : memref<1x1x16xf32, #tpu.memory_space<vmem>>, vector<1x1x16xf32>
      %37 = vector.shape_cast %36 : vector<1x1x16xf32> to vector<1x16xf32>
      %cst_24 = arith.constant -1.000000e+09 : f32
      %38 = vector.shape_cast %37 : vector<1x16xf32> to vector<1x16xf32>
      %39 = vector.broadcast %38 : vector<1x16xf32> to vector<16x16xf32>
      %40 = vector.broadcast %cst_24 : f32 to vector<16x16xf32>
      %41 = arith.select %35, %39, %40 : vector<16x16xi1>, vector<16x16xf32>
      %cst_25 = arith.constant dense<0xFF800000> : vector<16xf32>
      %42 = vector.multi_reduction <maximumf>, %41, %cst_25 [1] : vector<16x16xf32> to vector<16xf32>
      %43 = vector.shape_cast %42 : vector<16xf32> to vector<16x1xf32>
      %44 = vector.broadcast %43 : vector<16x1xf32> to vector<16x16xf32>
      %45 = arith.subf %41, %44 : vector<16x16xf32>
      %46 = math.exp %45 : vector<16x16xf32>
      %cst_26 = arith.constant dense<0.000000e+00> : vector<16xf32>
      %47 = vector.multi_reduction <add>, %46, %cst_26 [1] : vector<16x16xf32> to vector<16xf32>
      %48 = vector.shape_cast %47 : vector<16xf32> to vector<16x1xf32>
      %49 = tpu.reciprocal %48 {approx = true} : vector<16x1xf32> -> vector<16x1xf32>
      %50 = vector.broadcast %49 : vector<16x1xf32> to vector<16x16xf32>
      %51 = arith.mulf %46, %50 : vector<16x16xf32>
      %cst_27 = arith.constant 0.000000e+00 : f32
      %52 = vector.broadcast %cst_27 : f32 to vector<16x16xf32>
      %53 = arith.select %35, %51, %52 : vector<16x16xi1>, vector<16x16xf32>
      %54 = arith.truncf %53 : vector<16x16xf32> to vector<16x16xbf16>
      %c0_28 = arith.constant 0 : index
      %c0_29 = arith.constant 0 : index
      %c0_30 = arith.constant 0 : index
      %55 = vector.load %arg5[%c0_28, %c0_29, %c0_30] : memref<1x16x32xbf16, #tpu.memory_space<vmem>>, vector<1x16x32xbf16>
      %56 = vector.shape_cast %55 : vector<1x16x32xbf16> to vector<16x32xbf16>
      %cst_31 = arith.constant dense<0.000000e+00> : vector<16x32xf32>
      %57 = tpu.matmul %54, %56, %cst_31 {dimension_numbers = #tpu.dot_dimension_numbers<[1], [0], [0], [1], [0, 0, 1, 1], [], []>} : vector<16x16xbf16>, vector<16x32xbf16>, vector<16x32xf32> -> vector<16x32xf32>
      %58 = arith.truncf %57 : vector<16x32xf32> to vector<16x32xbf16>
      %c0_32 = arith.constant 0 : index
      %c0_33 = arith.constant 0 : index
      %59 = vector.load %arg12[%c0_32, %c0_33] : memref<16x40xbf16, #tpu.memory_space<vmem>>, vector<16x32xbf16>
      tpu.vector_store %arg12[%c0_32, %c0_33], %58 {strides = array<i32>} : memref<16x40xbf16, #tpu.memory_space<vmem>>, vector<16x32xbf16>,
      %c0_34 = arith.constant 0 : index
      %c0_35 = arith.constant 0 : index
      %c0_36 = arith.constant 0 : index
      %60 = vector.load %arg6[%c0_34, %c0_35, %c0_36] : memref<1x16x8xbf16, #tpu.memory_space<vmem>>, vector<1x16x8xbf16>
      %61 = vector.shape_cast %60 : vector<1x16x8xbf16> to vector<16x8xbf16>
      %c0_37 = arith.constant 0 : index
      %c32 = arith.constant 32 : index
      %62 = vector.load %arg12[%c0_37, %c32] : memref<16x40xbf16, #tpu.memory_space<vmem>>, vector<16x8xbf16>
      tpu.vector_store %arg12[%c0_37, %c32], %61 {strides = array<i32>} : memref<16x40xbf16, #tpu.memory_space<vmem>>, vector<16x8xbf16>,
      %c0_38 = arith.constant 0 : index
      %c0_39 = arith.constant 0 : index
      %63 = vector.load %arg10[%c0_38, %c0_39] : memref<1x32xf32, #tpu.memory_space<vmem>>, vector<1x32xf32>
      %64 = vector.shape_cast %63 : vector<1x32xf32> to vector<1x32xf32>
      %65 = vector.broadcast %64 : vector<1x32xf32> to vector<16x32xf32>
      %c0_40 = arith.constant 0 : index
      %c0_41 = arith.constant 0 : index
      %c0_42 = arith.constant 0 : index
      %66 = vector.load %arg11[%c0_40, %c0_41, %c0_42] : memref<1x16x32xf32, #tpu.memory_space<vmem>>, vector<1x16x32xf32>
      %67 = vector.shape_cast %66 : vector<1x16x32xf32> to vector<16x32xf32>
      %68 = vector.shape_cast %65 : vector<16x32xf32> to vector<1x16x32xf32>
      tpu.vector_store %arg11[%c0_40, %c0_41, %c0_42], %68 {strides = array<i32>} : memref<1x16x32xf32, #tpu.memory_space<vmem>>, vector<1x16x32xf32>,
    } else {
    }
    %c0 = arith.constant 0 : index
    %c0_1 = arith.constant 0 : index
    %3 = vector.load %arg12[%c0, %c0_1] : memref<16x40xbf16, #tpu.memory_space<vmem>>, vector<16x40xbf16>
    %c0_2 = arith.constant 0 : index
    %c0_3 = arith.constant 0 : index
    %4 = vector.load %arg8[%c0_2, %c0_3] : memref<40x64xbf16, #tpu.memory_space<vmem>>, vector<40x64xbf16>
    %cst = arith.constant dense<0.000000e+00> : vector<16x64xf32>
    %5 = tpu.matmul %3, %4, %cst {dimension_numbers = #tpu.dot_dimension_numbers<[1], [0], [0], [1], [0, 0, 1, 1], [], []>} : vector<16x40xbf16>, vector<40x64xbf16>, vector<16x64xf32> -> vector<16x64xf32>
    %c0_4 = arith.constant 0 : index
    %c0_5 = arith.constant 0 : index
    %c0_6 = arith.constant 0 : index
    %6 = vector.load %arg7[%c0_4, %c0_5, %c0_6] : memref<1x1x64xf32, #tpu.memory_space<vmem>>, vector<1x1x64xf32>
    %7 = vector.shape_cast %6 : vector<1x1x64xf32> to vector<1x64xf32>
    %8 = vector.broadcast %7 : vector<1x64xf32> to vector<16x64xf32>
    %9 = arith.addf %5, %8 : vector<16x64xf32>
    %cst_7 = arith.constant 0.000000e+00 : f32
    %10 = vector.broadcast %cst_7 : f32 to vector<16x64xf32>
    %11 = arith.maximumf %9, %10 : vector<16x64xf32>
    %c0_8 = arith.constant 0 : index
    %c0_9 = arith.constant 0 : index
    %c0_10 = arith.constant 0 : index
    %12 = vector.load %arg11[%c0_8, %c0_9, %c0_10] : memref<1x16x32xf32, #tpu.memory_space<vmem>>, vector<1x16x32xf32>
    %13 = vector.shape_cast %12 : vector<1x16x32xf32> to vector<16x32xf32>
    %14 = arith.truncf %11 : vector<16x64xf32> to vector<16x64xbf16>
    %c0_11 = arith.constant 0 : index
    %c0_12 = arith.constant 0 : index
    %15 = vector.load %arg9[%c0_11, %c0_12] : memref<64x32xbf16, #tpu.memory_space<vmem>>, vector<64x32xbf16>
    %cst_13 = arith.constant dense<0.000000e+00> : vector<16x32xf32>
    %16 = tpu.matmul %14, %15, %cst_13 {dimension_numbers = #tpu.dot_dimension_numbers<[1], [0], [0], [1], [0, 0, 1, 1], [], []>} : vector<16x64xbf16>, vector<64x32xbf16>, vector<16x32xf32> -> vector<16x32xf32>
    %17 = arith.addf %13, %16 : vector<16x32xf32>
    %c0_14 = arith.constant 0 : index
    %c0_15 = arith.constant 0 : index
    %c0_16 = arith.constant 0 : index
    %18 = vector.load %arg11[%c0_14, %c0_15, %c0_16] : memref<1x16x32xf32, #tpu.memory_space<vmem>>, vector<1x16x32xf32>
    %19 = vector.shape_cast %18 : vector<1x16x32xf32> to vector<16x32xf32>
    %20 = vector.shape_cast %17 : vector<16x32xf32> to vector<1x16x32xf32>
    tpu.vector_store %arg11[%c0_14, %c0_15, %c0_16], %20 {strides = array<i32>} : memref<1x16x32xf32, #tpu.memory_space<vmem>>, vector<1x16x32xf32>,
    return
  }
  func.func @transform_0(%arg0: i32, %arg1: i32, %arg2: i32) -> (i32, i32, i32) {
    %c0_i32 = arith.constant 0 : i32
    %c0_i32_0 = arith.constant 0 : i32
    return %arg0, %arg1, %c0_i32 : i32, i32, i32
  }
  func.func @transform_1(%arg0: i32, %arg1: i32, %arg2: i32) -> (i32, i32, i32) {
    %c0_i32 = arith.constant 0 : i32
    %c0_i32_0 = arith.constant 0 : i32
    %c0_i32_1 = arith.constant 0 : i32
    return %arg0, %c0_i32, %c0_i32_0 : i32, i32, i32
  }
  func.func @transform_2(%arg0: i32, %arg1: i32, %arg2: i32) -> (i32, i32, i32) {
    %c0_i32 = arith.constant 0 : i32
    %c0_i32_0 = arith.constant 0 : i32
    %c0_i32_1 = arith.constant 0 : i32
    return %arg0, %c0_i32, %c0_i32_0 : i32, i32, i32
  }
  func.func @transform_3(%arg0: i32, %arg1: i32, %arg2: i32) -> (i32, i32, i32) {
    %c0_i32 = arith.constant 0 : i32
    %c0_i32_0 = arith.constant 0 : i32
    return %arg0, %arg1, %c0_i32 : i32, i32, i32
  }
  func.func @transform_4(%arg0: i32, %arg1: i32, %arg2: i32) -> (i32, i32, i32) {
    %c0_i32 = arith.constant 0 : i32
    %c0_i32_0 = arith.constant 0 : i32
    return %arg0, %c0_i32, %arg2 : i32, i32, i32
  }
  func.func @transform_5(%arg0: i32, %arg1: i32, %arg2: i32) -> (i32, i32) {
    %c0_i32 = arith.constant 0 : i32
    %c0_i32_0 = arith.constant 0 : i32
    return %c0_i32, %arg2 : i32, i32
  }
  func.func @transform_6(%arg0: i32, %arg1: i32, %arg2: i32) -> (i32, i32) {
    %c0_i32 = arith.constant 0 : i32
    %c0_i32_0 = arith.constant 0 : i32
    return %arg2, %c0_i32 : i32, i32
  }
  func.func @transform_7(%arg0: i32, %arg1: i32, %arg2: i32) -> (i32, i32) {
    %c0_i32 = arith.constant 0 : i32
    %c0_i32_0 = arith.constant 0 : i32
    %c0_i32_1 = arith.constant 0 : i32
    return %c0_i32, %c0_i32_0 : i32, i32
  }
  func.func @transform_8(%arg0: i32, %arg1: i32, %arg2: i32) -> (i32, i32, i32) {
    %c0_i32 = arith.constant 0 : i32
    %c0_i32_0 = arith.constant 0 : i32
    return %arg0, %arg1, %c0_i32 : i32, i32, i32
  }
}

</mosaic_0001>

<bundles_post_ra>
// kernel: tpu_custom_call.1
= control target key start
LH: loop header
LB: loop body
LE: loop exit
PB: predicated region body
PF: predicated region fallthrough
CT: control target
= control target key end

     0   :  { %13 = vsyncpa [#allocation4], 0  ;;  %s1456_s0 = inlined_call_operand.vmem [shape: s32[2,16,3], index: 0, kind: input, shape index: {}]   ;;  %s1457_s1 = inlined_call_operand.vmem [shape: f32[2,1,16], index: 1, kind: input, shape index: {}]   ;;  %s1458_s2 = inlined_call_operand.vmem [shape: bf16[2,16,32], index: 2, kind: input, shape index: {}]   ;;  %s1459_s3 = inlined_call_operand.vmem [shape: bf16[2,16,8], index: 3, kind: input, shape index: {}]   ;;  %s1460_s4 = inlined_call_operand.vmem [shape: f32[2,1,64], index: 4, kind: input, shape index: {}]   ;;  %s1461_s5 = inlined_call_operand.vmem [shape: bf16[40,64], index: 5, kind: input, shape index: {}]   ;;  %s1462_s6 = inlined_call_operand.vmem [shape: bf16[64,32], index: 6, kind: input, shape index: {}]   ;;  %s1463_s7 = inlined_call_operand.vmem [shape: f32[1,32], index: 7, kind: input, shape index: {}]   ;;  %s1464_s8 = inlined_call_operand.hbm [shape: f32[2,16,32], index: 8, kind: output, shape index: {}]  }
   0x1   :  { %15 = vsyncpa [#allocation4 + $0x1], 0  ;;  %s1266_s27 = smov 0   ;;  %s1268_s28 = smov 0  }
   0x2   :  { %s1270_s29 = smov 0   ;;  %s1272_s30 = smov 0  }
   0x3   :  { %s1274_s9 = smov 0   ;;  %s1276_s10 = smov 0  }
   0x4 LB: > { %s971_s11 = sadd.s32 4294967295, %s1210_s10   ;;  %s972_s12 = sadd.s32 4294967294, %s1210_s10   ;;  %s1210_s10 = sphi %s1276_s10, %s21_s10   ;;  %s1206_s9 = sphi %s1274_s9, %s1475_s9   ;;  %s1202_s30 = sphi %s1272_s30, %s1474_s30   ;;  %s1198_s29 = sphi %s1270_s29, %s1473_s29   ;;  %s1194_s28 = sphi %s1268_s28, %s1472_s28   ;;  %s1190_s27 = sphi %s1266_s27, %s1471_s27  }
   0x5   : > { %s40_s13 = sadd.s32 1, %s1206_s9  ;;  %s258_s14 = sadd.s32 1, %s1198_s29 }
   0x6   : > { %p42_p0 = scmp.ge.s32.totalorder %s40_s13, 2  ;;  %p268_p1 = scmp.ne.s32.totalorder %s1198_s29, %s1194_s28 }
   0x7   : > { %p269_p2 = scmp.eq.s32.totalorder %s971_s11, 1  ;;  %p274_p3 = scmp.ne.s32.totalorder %s1194_s28, %s1190_s27 }
   0x8   : > { %s1477_s13 = smov (%p42_p0, %s40_s13), 0  ;;  %p275_p5 = scmp.eq.s32.totalorder %s972_s12, 1 }
   0x9   : > { %p1306_p4 = por %p269_p2, %p268_p1  ;;  %s253_s16 = ssub.s32 %s1206_s9, %s1477_s13 }
   0xa   : > { %p977_p6 = scmp.ge.s32.totalorder %s1210_s10, 1  ;;  %p256_p7 = scmp.eq.s32.totalorder %s253_s16, 0 }
   0xb   : > { %p1313_p8 = por %p275_p5, %p274_p3  ;;  %p361_p9 = scmp.lt.s32.totalorder %s1210_s10, 3 }
   0xc   : > { %s1319_s18 = scalar_select %p256_p7, %s1198_s29, %s258_s14  }
   0xd   : > { %p362_p10 = pnand %p977_p6, %p361_p9 }
   0xe   : > { %p432_p11 = scmp.lt.s32.totalorder (!%p362_p10), %s1202_s30, 1  ;;  %v1212_v0 = vmov (!%p362_p10), 1   ;;  %v1213_v1 = vmov (!%p362_p10), 0   ;;  %v1214_v6 = vmov (!%p362_p10), 2   ;;  %v485_v7 = vlaneseq (!%p362_p10)  ;;  %v1117_v44 = vld [vmem:[%s1461_s5] sm:$0xff] (!%p362_p10)   ;;  %v1118_v45 = vld [vmem:[%s1461_s5 + $0x8] sm:$0xff] (!%p362_p10)  }
   0xf   : > { %365 = sbr.rel (%p362_p10) target bundleno = 1161 (0x489), region = 52  ;;  %1112 = vset.pattern.permute.xlu1 (!%p362_p10), %v1212_v0  ;;  %1111 = vset.pattern.permute.xlu0 (!%p362_p10), %v1213_v1  ;;  %vm526_vm10 = vcmask (!%p362_p10), 130048   ;;  %v1215_v32 = vmov (!%p362_p10), 0.0   ;;  %vm1216_vm13 = vmmov (!%p362_p10), 0   ;;  %v1119_v46 = vld [vmem:[%s1461_s5 + $0x10] ss:$0 sps:$4 sm:$0xff] (!%p362_p10)  }
  0x10   : > { %v486_v10 = vand.u32 (!%p362_p10), 127, %v485_v7  ;;  %1020 = vmatprep.subr.bf16.mxu1 (!%p362_p10), %v1215_v32  ;;  %1022 = vmatprep.mubr.msk.bf16.mxu1 (!%p362_p10), %vm1216_vm13, %v1215_v32  ;;  %vm660_vm14 = vcmask (!%p362_p10), 1043456   ;;  %v1120_v48 = vld [vmem:[%s1462_s6] sm:$0xff] (!%p362_p10)   ;;  %v1121_v49 = vld [vmem:[%s1462_s6 + $0x8] sm:$0xff] (!%p362_p10)   ;;  %vm605_vm15 = vcmask (!%p362_p10), 261120   ;;  %v1122_v57 = vld [vmem:[%s1462_s6 + $0x10] sm:$0xff] (!%p362_p10)  }
  0x11   : > { %1036 = vmatprep.subr.bf16.mxu0 (!%p362_p10), %v1215_v32  ;;  %1044 = vmatprep.mubr.msk.bf16.mxu0 (!%p362_p10), %vm1216_vm13, %v1215_v32  ;;  %v662_v47 = vsel (!%p362_p10), %vm660_vm14, %v1119_v46, 0  ;;  %v1123_v58 = vld [vmem:[%s1462_s6 + $0x18] sm:$0xff] (!%p362_p10)   ;;  %v989_v59 = vld [vmem:[%s1463_s7] ss:$0 sm:$0xff] (!%p362_p10)  ;;  %s1008_s24 = sshll.u32 (!%p362_p10), %s1202_s30, 8 }
  0x12   : > { %1037 = vmatpush3.bf16.msra.mxu0 (!%p362_p10), %v1120_v48  ;;  %s1402_s12 = scalar_lea.hbm (!%p362_p10), %s1464_s8, %s1008_s24 }
  0x13   : > { %1038 = vmatprep.subr.bf16.mxu0 (!%p362_p10), %v1215_v32 }
  0x16   : > { %s1323_s19 = scalar_select %p432_p11, %s1202_s30, 1  ;;  %1039 = vmatpush3.bf16.msra.mxu0 %v1121_v49 }
  0x17   : > { %1040 = vmatprep.subr.bf16.mxu0 %v1215_v32 }
  0x18   : > { %s1005_s20 = sshll.u32 %s1323_s19, 4  ;;  %s443_s26 = scalar_lea.vmem %s1457_s1, %s1323_s19 }
  0x19   : > { %s439_s23 = scalar_lea.vmem %s1456_s0, %s1005_s20  ;;  %v985_v15 = vld [vmem:[%s443_s26] ss:$0 sm:$0xff]  ;;  %s1006_s11 = sshll.u32 %s1323_s19, 3 }
  0x1a   : > { %v481_v2 = vld [vmem:[%s439_s23] sm:$0xff]  ;;  %v482_v3 = vld [vmem:[%s439_s23 + $0x8] sm:$0xff]  ;;  %s448_s16 = scalar_lea.vmem %s1458_s2, %s1006_s11  ;;  %s457_s22 = scalar_lea.vmem %s1459_s3, %s1006_s11  ;;  %1041 = vmatpush3.bf16.msra.mxu0 %v1122_v57 }
  0x1b   : > { %496 = vperm.xlu1 %1112, %v481_v2   ;;  %488 = vperm.xlu0 %1111, %v481_v2   ;;  %vm484_vm0 = vcmp.ne.s32.totalorder %v482_v3, 0  ;;  %vm483_vm1 = vcmp.ne.s32.totalorder %v481_v2, 0  ;;  %v1115_v33 = vld [vmem:[%s448_s16] sm:$0xff]   ;;  %s1217_s23 = smov 32   ;;  %s428_s11 = sand.u32 1, %s1194_s28  }
  0x1c   : > { %v506_v4 = vsel %vm484_vm0, 1, %v1213_v1  ;;  %v505_v5 = vsel %vm483_vm1, 1, %v1213_v1  ;;  %1021 = vmatpush3.bf16.msra.mxu1 %v1115_v33  ;;  %v1116_v34 = vld [vmem:[%s457_s22] sm:$0xff]   ;;  %vm617_vm0 = vcmask 326912   ;;  %vm656_vm1 = vcmask 326656   ;;  %1042 = vmatprep.subr.bf16.mxu0 %v1215_v32  ;;  %s978_s16 = sshll.u32 %s428_s11, 4 }
  0x1d   : > { %1026 = vmatprep.subr.bf16.mxu1 %v1215_v32  ;;  %s430_s20 = scalar_lea.vmem [#allocation3], %s978_s16  ;;  %s1410_s30 = scalar_lea.sflag [#allocation4], %s428_s11 }
  0x1e   : > { %1043 = vmatpush3.bf16.msra.mxu0 %v1123_v58  ;;  %626 = vst.msk [vmem:[%s430_s20] sm:$0xff] %vm605_vm15, %v989_v59  ;;  %627 = vst.msk [vmem:[%s430_s20 + $0x8] sm:$0xff] %vm605_vm15, %v989_v59  ;;  %s808_s25 = sshll.u32 %s430_s20, 4  ;;  %s1218_s16 = smov [#allocation3]   ;;  %s1404_s25 = int_to_ptr.vmem [resolvable:$true] %s808_s25 }
  0x1f   : > { %499 = vperm.xlu1 %1112, %v482_v3   ;;  %491 = vperm.xlu0 %1111, %v482_v3   ;;  %s1132_s14 = scalar_lea.vmem %s1404_s25, 256  ;;  %s1136_s21 = sshll.u32 %s1218_s16, 4  ;;  %s1137_s21 = int_to_ptr.vmem [resolvable:$false] %s1136_s21 }
  0x20   : > { %p1133_p12 = scmp.ne.s32.totalorder %s1404_s25, %s1132_s14  ;;  %s1138_s22 = scalar_lea.vmem %s1137_s21, 512 }
  0x21   : > { %p1139_p1 = scmp.lt.s32.totalorder %s1404_s25, %s1137_s21  ;;  %p1140_p2 = scmp.lt.s32.totalorder %s1138_s22, %s1132_s14 }
  0x22   : > { %p1134_p13 = pnand %p1133_p12, %p1306_p4 }
  0x23   : > { %1114 = vset.pattern.permute.xlu1 %v1214_v6  ;;  %1113 = vset.pattern.permute.xlu0 %v1214_v6  ;;  %p1141_p3 = por %p1140_p2, %p1139_p1 }
  0x24   : > { %511 = vperm.xlu1 %1114, %v506_v4   ;;  %508 = vperm.xlu0 %1113, %v505_v5   ;;  %p1135_p0 = pneg %p1134_p13 }
  0x25   : > { %v707_v6 = vld [vmem:[%s430_s20] sm:$0xff] }
  0x26   : > { %p1142_p5 = pnand %p1141_p3, %p1135_p0 }
  0x9a   : > { %v497_v8 = vpop.permute.xlu1 %496  ;;  %v489_v9 = vpop.permute.xlu0 %488 }
  0x9b   : > { %vm501_vm2 = vcmp.le.s32.totalorder %v486_v10, %v497_v8  ;;  %vm493_vm3 = vcmp.ge.s32.totalorder %v486_v10, %v489_v9  ;;  %v708_v8 = vld [vmem:[%s430_s20 + $0x8] sm:$0xff] }
  0x9c   : > { %vm503_vm6 = vmand %vm493_vm3, %vm501_vm2  ;;  %vm742_vm2 = vcmask 523264  }
  0x9e   : > { %v500_v11 = vpop.permute.xlu1 %499  ;;  %v492_v12 = vpop.permute.xlu0 %491 }
  0x9f   : > { %vm502_vm4 = vcmp.le.s32.totalorder %v486_v10, %v500_v11  ;;  %vm494_vm5 = vcmp.ge.s32.totalorder %v486_v10, %v492_v12 }
  0xa0   : > { %vm504_vm7 = vmand %vm494_vm5, %vm502_vm4 }
  0xa3   : > { %v512_v13 = vpop.permute.xlu1 %511  ;;  %v509_v14 = vpop.permute.xlu0 %508 }
  0xa4   : > { %vm514_vm8 = vcmp.eq.s32.totalorder %v512_v13, 1  ;;  %vm513_vm9 = vcmp.eq.s32.totalorder %v509_v14, 1 }
  0xa5   : > { %vm1333_vm11 = vmand %vm504_vm7, %vm514_vm8 }
  0xa6   : > { %vm1337_vm12 = vmand %vm503_vm6, %vm513_vm9  ;;  %v525_v18 = vsel %vm1333_vm11, %v985_v15, -1e+09 }
  0xa7   : > { %v530_v19 = vsel %vm526_vm10, %v525_v18, -inf  ;;  %v524_v20 = vsel %vm1337_vm12, %v985_v15, -1e+09 }
  0xa8   : > { %531 = vmax.xlane.f32.xlu0 %v530_v19  ;;  %v527_v21 = vsel %vm526_vm10, %v524_v20, -inf }
  0xa9   : > { %528 = vmax.xlane.f32.xlu1 %v527_v21 }
 0x135   : > { %v532_v22 = vpop.xlane.xlu0 %531 }
 0x136   : > { %v529_v23 = vpop.xlane.xlu1 %528  ;;  %v534_v24 = vsub.f32 %v525_v18, %v532_v22 }
 0x137   : > { %v533_v25 = vsub.f32 %v524_v20, %v529_v23 }
 0x138   : > { %v537_v26 = vmul.f32 1.442695, %v534_v24 }
 0x139   : > { %v535_v27 = vmul.f32 1.442695, %v533_v25 }
 0x13a   : > { %1124 = vpow2.f32 %v537_v26 }
 0x13b   : > { %1126 = vpow2.f32 %v535_v27 }
 0x144   : > { %v1125_v28 = vpop.eup %1124 }
 0x145   : > { %v1127_v29 = vpop.eup %1126  ;;  %v542_v30 = vsel %vm526_vm10, %v1125_v28, 0.0 }
 0x146   : > { %v539_v31 = vsel %vm526_vm10, %v1127_v29, 0.0  ;;  %543 = vadd.xlane.f32.xlu1 %v542_v30 }
 0x147   : > { %540 = vadd.xlane.f32.xlu0 %v539_v31 }
 0x15d   : > { %614 = vrot.lane.b32.xlu0 %v1116_v34, %s1217_s23  ;;  %s464_s23 = scalar_lea.vmem %s1460_s4, %s1323_s19 }
 0x15e   : > { %v990_v60 = vld [vmem:[%s464_s23] ss:$0 sm:$0xff] }
 0x1d3   : > { %v544_v35 = vpop.xlane.xlu1 %543 }
 0x1d4   : > { %1128 = vrcp.f32 %v544_v35  ;;  %v541_v36 = vpop.xlane.xlu0 %540 }
 0x1d5   : > { %1130 = vrcp.f32 %v541_v36 }
 0x1d8   : > { %v615_v55 = vpop.permute.xlu0 %614 }
 0x1de   : > { %v1129_v37 = vpop.eup %1128 }
 0x1df   : > { %v1131_v38 = vpop.eup %1130  ;;  %v548_v39 = vmul.f32 %v1129_v37, %v1125_v28 }
 0x1e0   : > { %v547_v40 = vmul.f32 %v1131_v38, %v1127_v29 }
 0x1e1   : > { %v550_v41 = vsel %vm1333_vm11, %v548_v39, 0.0 }
 0x1e2   : > { %v549_v42 = vsel %vm1337_vm12, %v547_v40, 0.0 }
 0x1e3   : > { %v551_v43 = vpack.c.bf16 %v550_v41, %v549_v42 }
 0x1e5   : > { %1023 = vmatmul.mubr.msk.bf16.vlgmr.msra.gmra.mrb[0].mxu1 %vm526_vm10, %v551_v43 }
 0x1e6   : > { %1032 = vmatprep.mubr.msk.bf16.mxu1 %vm1216_vm13, %v1215_v32  ;;  %1027 = vmatpush3.bf16.msra.mxu1 %v1117_v44 }
 0x1e7   : > { %1028 = vmatprep.subr.bf16.mxu1 %v1215_v32 }
 0x1ea   : > { %1029 = vmatpush3.bf16.msra.mxu1 %v1118_v45 }
 0x1eb   : > { %1030 = vmatprep.subr.bf16.mxu1 %v1215_v32 }
 0x1ee   : > { %1031 = vmatpush3.bf16.msra.mxu1 %v662_v47 }
 0x2b8   : > { %v597_v50 = vpop.f32.mrb[0].mxu1 }
 0x2b9   : > { %v1024_v51 = vpop.f32.mrb[1].mxu1 }
 0x2ba   : > { %v600_v52 = vpop.f32.mrb[2].mxu1 }
 0x2bb   : > { %v604_v53 = vpack.c.bf16 %v600_v52, %v597_v50  ;;  %v1025_v54 = vpop.f32.mrb[3].mxu1 }
 0x2bd   : > { %606 = vst.msk [vmem:[#allocation2] sm:$0xff] %vm605_vm15, %v604_v53 }
 0x2be   : > { %618 = vst.msk [vmem:[#allocation2] sm:$0xff] %vm617_vm0, %v615_v55 }
 0x2c5   : > { %v628_v56 = vld [vmem:[#allocation2] sm:$0xff] }
 0x2c6   : > { %1033 = vmatmul.mubr.msk.bf16.vlgmr.msra.gmra.mrb[4].mxu1 %vm656_vm1, %v628_v56 }
 0x399   : > { %v698_v61 = vpop.f32.mrb[4].mxu1 }
 0x39a   : > { %v699_v62 = vadd.f32 %v990_v60, %v698_v61  ;;  %v1034_v63 = vpop.f32.mrb[5].mxu1 }
 0x39b   : > { %v701_v0 = vpop.f32.mrb[6].mxu1 }
 0x39c   : > { %v702_v1 = vadd.f32 %v990_v60, %v701_v0  ;;  %v1035_v2 = vpop.f32.mrb[7].mxu1  ;;  %v705_v3 = vmax.f32 %v699_v62, 0.0 }
 0x39e   : > { %v706_v4 = vmax.f32 %v702_v1, 0.0 }
 0x3a0   : > { %v709_v5 = vpack.c.bf16 %v706_v4, %v705_v3 }
 0x3a2   : > { %1045 = vmatmul.mubr.msk.bf16.vlgmr.msra.gmra.mrb[0].mxu0 %vm742_vm2, %v709_v5 }
 0x475   : > { %v780_v7 = vpop.f32.mrb[0].mxu0 }
 0x476   : > { %v787_v9 = vadd.f32 %v780_v7, %v707_v6  ;;  %v1046_v10 = vpop.f32.mrb[1].mxu0 }
 0x477   : > { %v783_v11 = vpop.f32.mrb[2].mxu0 }
 0x478   : > { %790 = vst.msk [vmem:[%s430_s20] sm:$0xff] %vm605_vm15, %v787_v9  ;;  %v788_v12 = vadd.f32 %v783_v11, %v708_v8  ;;  %v1047_v13 = vpop.f32.mrb[3].mxu0 }
 0x47a   : > { %791 = vst.msk [vmem:[%s430_s20 + $0x8] sm:$0xff] %vm605_vm15, %v788_v12 }
 0x47b   : > { %1145 = shalt.err (!%p1142_p5)
}
 0x47c   : > { %s1146_s11 = scalar_lea.hbm %s1402_s12, 256  ;;  %s1150_s24 = scalar_lea.hbm %s1464_s8, 512 }
 0x47d   : > { %p1147_p6 = scmp.ne.s32.totalorder %s1402_s12, %s1146_s11  ;;  %p1151_p10 = scmp.lt.u32.totalorder %s1402_s12, %s1464_s8 }
 0x47e   : > { %p1152_p11 = scmp.lt.u32.totalorder %s1150_s24, %s1146_s11  ;;  %p1154_p13 = scmp.lt.u32.totalorder %s1146_s11, %s1402_s12 }
 0x47f   : > { %p1148_p7 = pnand %p1147_p6, %p1306_p4 }
 0x480   : > { %p1153_p12 = por %p1152_p11, %p1151_p10 }
 0x481   : > { %p1149_p9 = pneg %p1148_p7 }
 0x482   : > { %p1155_p0 = por %p1154_p13, %p1153_p12 }
 0x484   : > { %p1156_p1 = pnand %p1155_p0, %p1149_p9 }
 0x486   : > { %1159 = shalt.err (!%p1156_p1)
}
 0x487   : > { %s1219_s14 = smov 128   ;;  %s1220_s16 = smov 8  }
 0x488   : > { %1048 = dma.vmem_to_hbm [thread:$0]  (%p1306_p4), %s1404_s25, 256, %s1402_s12, %s1410_s30, %s1219_s14, %s1219_s14, %s1220_s16  }
 0x489 PF: > { %p1054_p2 = scmp.ge.s32.totalorder %s1210_s10, 2  ;;  %s823_s21 = sand.u32 1, %s1190_s27  }
 0x48a   : > { %s824_s22 = scalar_lea.sflag [#allocation4], %s823_s21 }
 0x48b   : > { %p1051_p3 = pnand %p1054_p2, %p1313_p8 }
 0x48d   : > { %1185 = dma.done.wait (!%p1051_p3), %s824_s22, 256  }
 0x48e   : > { %1187 = vsyncadd (!%p1051_p3), %s824_s22, 4294967040  ;;  %s21_s10 = sadd.s32 1, %s1210_s10   ;;  %s1471_s27 = smov %s1194_s28 }
 0x48f   : > { %p18_p5 = scmp.ge.s32.totalorder %s21_s10, 4   ;;  %s1472_s28 = smov %s1198_s29 }
 0x490   : > { %s1473_s29 = smov %s1319_s18  ;;  %s1474_s30 = smov %s1206_s9 }
 0x491   : > { %s1475_s9 = smov %s1477_s13  ;;  %20 = sbr.rel (!%p18_p5) target bundleno = 4 (0x4), region = 109 }
 0x498   :  { %829 = vsyncpa [#allocation4], 1 }
 0x499   :  { %831 = vsyncpa [#allocation4 + $0x1], 1 }

</bundles_post_ra>
